<compile_context>
chip_gen: v7x
topology: tpu7x:2x2x1
jax: 0.10.0
libtpu: 0.0.40
codegen_flags: <defaults>
</compile_context>

<pallas_src>
import jax
import jax.numpy as jnp
from jax.experimental import pallas as pl
from jax.experimental.pallas import tpu as pltpu


def _round_up(x, m):
    return ((x + m - 1) // m) * m


def _mlp_kernel(x_ref, w1_ref, b1_ref, w2_ref, b2_ref, w3_ref, b3_ref, o_ref):
    x = x_ref[...]  # (TB, n_input) bf16

    # fc_1 + relu  (bf16 MXU, f32 accumulate; bias/ReLU in f32)
    h1 = jnp.dot(x, w1_ref[...], preferred_element_type=jnp.float32) + b1_ref[...]
    h1 = jnp.maximum(h1, 0.0)

    # dropout_1: identity (eval mode)

    # fc_2 + relu
    h2 = jnp.dot(h1.astype(jnp.bfloat16), w2_ref[...],
                 preferred_element_type=jnp.float32) + b2_ref[...]
    h2 = jnp.maximum(h2, 0.0)

    # dropout_2: identity (eval mode)

    # fc_3 (logits, no activation) -> lane-dense padded output (TB, 128*k)
    out = jnp.dot(h2.astype(jnp.bfloat16), w3_ref[...],
                  preferred_element_type=jnp.float32) + b3_ref[...]
    o_ref[...] = out.astype(o_ref.dtype)


def mlp_forward(x, params, tb=512):
    """x: (B, n_input) f32. params: dict of w1,b1,w2,b2,w3,b3 (weights as (in,out))."""
    w1, b1 = params["w1"], params["b1"]
    w2, b2 = params["w2"], params["b2"]
    w3, b3 = params["w3"], params["b3"]

    B, n_input = x.shape
    n_units_1 = w1.shape[1]
    n_units_2 = w2.shape[1]
    n_classes = w3.shape[1]

    # Batch tiling: TB rows per grid step (sublane-aligned), batch padded to TB.
    b8 = _round_up(B, 8)
    TB = min(tb, b8)
    B_pad = _round_up(B, TB)

    # Lane-dense output: pad logits dim up to a multiple of 128.
    NOUT = _round_up(n_classes, 128)

    # Prepare padded / cast operands (bf16 MXU inputs, f32 biases).
    x_p = jnp.zeros((B_pad, n_input), jnp.float32).at[:B, :].set(x).astype(jnp.bfloat16)
    w1b = w1.astype(jnp.bfloat16)
    w2b = w2.astype(jnp.bfloat16)
    w3b = jnp.zeros((n_units_2, NOUT), jnp.float32).at[:, :n_classes].set(w3).astype(jnp.bfloat16)
    b3p = jnp.zeros((1, NOUT), jnp.float32).at[:, :n_classes].set(b3)

    grid = (B_pad // TB,)
    resident = lambda shape: pl.BlockSpec(shape, lambda i: (0, 0))

    out_padded = pl.pallas_call(
        _mlp_kernel,
        out_shape=jax.ShapeDtypeStruct((B_pad, NOUT), jnp.float32),
        grid_spec=pltpu.PrefetchScalarGridSpec(
            num_scalar_prefetch=0,
            grid=grid,
            in_specs=[
                pl.BlockSpec((TB, n_input), lambda i: (i, 0)),   # x: batch-tiled
                resident((n_input, n_units_1)),                  # w1
                resident((1, n_units_1)),                        # b1
                resident((n_units_1, n_units_2)),                # w2
                resident((1, n_units_2)),                        # b2
                resident((n_units_2, NOUT)),                     # w3 (lane-padded)
                resident((1, NOUT)),                             # b3 (lane-padded)
            ],
            out_specs=pl.BlockSpec((TB, NOUT), lambda i: (i, 0)),
        ),
        compiler_params=pltpu.CompilerParams(
            dimension_semantics=("parallel",),
        ),
    )(x_p, w1b, b1, w2b, b2, w3b, b3p)

    return out_padded[:B, :n_classes]


def init_linear(key, fan_in, fan_out):
    """Deterministic PyTorch-style Linear init: U(-1/sqrt(fan_in), 1/sqrt(fan_in)).
    Returned weight is (fan_in, fan_out) (transpose of torch layout)."""
    kw, kb = jax.random.split(key)
    bound = 1.0 / jnp.sqrt(jnp.float32(fan_in))
    w = jax.random.uniform(kw, (fan_in, fan_out), jnp.float32, -bound, bound)
    b = jax.random.uniform(kb, (1, fan_out), jnp.float32, -bound, bound)
    return w, b


if __name__ == "__main__":
    # Small shapes consistent with the module: an MLP classifier.
    batch = 8
    n_input = 32
    n_units_1 = 64
    n_units_2 = 64
    n_classes = 16

    key = jax.random.PRNGKey(0)
    kx, k1, k2, k3 = jax.random.split(key, 4)

    x = jax.random.normal(kx, (batch, n_input), jnp.float32)
    w1, b1 = init_linear(k1, n_input, n_units_1)
    w2, b2 = init_linear(k2, n_units_1, n_units_2)
    w3, b3 = init_linear(k3, n_units_2, n_classes)
    params = {"w1": w1, "b1": b1, "w2": w2, "b2": b2, "w3": w3, "b3": b3}

    out = mlp_forward(x, params)
    jax.block_until_ready(out)

    # Pure-JAX reference with matching bf16-in / f32-accumulate numerics.
    xb = x.astype(jnp.bfloat16)
    h1 = jnp.maximum(
        jnp.dot(xb, w1.astype(jnp.bfloat16), preferred_element_type=jnp.float32) + b1, 0.0)
    h2 = jnp.maximum(
        jnp.dot(h1.astype(jnp.bfloat16), w2.astype(jnp.bfloat16),
                preferred_element_type=jnp.float32) + b2, 0.0)
    ref = jnp.dot(h2.astype(jnp.bfloat16), w3.astype(jnp.bfloat16),
                  preferred_element_type=jnp.float32) + b3

    assert out.shape == (batch, n_classes)
    assert jnp.allclose(out, ref, atol=2e-3, rtol=2e-3), float(jnp.max(jnp.abs(out - ref)))

    # Sanity check against full-f32 math (loose: bf16 weight rounding).
    h1f = jnp.maximum(x @ w1 + b1, 0.0)
    h2f = jnp.maximum(h1f @ w2 + b2, 0.0)
    reff = h2f @ w3 + b3
    assert jnp.allclose(out, reff, atol=5e-2, rtol=5e-2)

    print("KERNEL_OK")
</pallas_src>

<mosaic_0001>
module attributes {stable_mosaic.version = 11 : i64} {
  func.func @_mlp_kernel(%arg0: i32, %arg1: memref<8x32xbf16, #tpu.memory_space<vmem>>, %arg2: memref<32x64xbf16, #tpu.memory_space<vmem>>, %arg3: memref<1x64xf32, #tpu.memory_space<vmem>>, %arg4: memref<64x64xbf16, #tpu.memory_space<vmem>>, %arg5: memref<1x64xf32, #tpu.memory_space<vmem>>, %arg6: memref<64x128xbf16, #tpu.memory_space<vmem>>, %arg7: memref<1x128xf32, #tpu.memory_space<vmem>>, %arg8: memref<8x128xf32, #tpu.memory_space<vmem>>) attributes {dimension_semantics = [#tpu.dimension_semantics<parallel>], iteration_bounds = array<i64: 1>, scalar_prefetch = 0 : i64, scratch_operands = 0 : i64, tpu.core_type = #tpu.core_type<tc>, window_params = [{transform_indices = @transform_0, window_bounds = array<i64: 8, 32>}, {pipeline_mode = #tpu.pipeline_mode<synchronous>, transform_indices = @transform_1, window_bounds = array<i64: 32, 64>}, {pipeline_mode = #tpu.pipeline_mode<synchronous>, transform_indices = @transform_2, window_bounds = array<i64: 1, 64>}, {pipeline_mode = #tpu.pipeline_mode<synchronous>, transform_indices = @transform_3, window_bounds = array<i64: 64, 64>}, {pipeline_mode = #tpu.pipeline_mode<synchronous>, transform_indices = @transform_4, window_bounds = array<i64: 1, 64>}, {pipeline_mode = #tpu.pipeline_mode<synchronous>, transform_indices = @transform_5, window_bounds = array<i64: 64, 128>}, {pipeline_mode = #tpu.pipeline_mode<synchronous>, transform_indices = @transform_6, window_bounds = array<i64: 1, 128>}, {transform_indices = @transform_7, window_bounds = array<i64: 8, 128>}]} {
    %c0 = arith.constant 0 : index
    %c0_0 = arith.constant 0 : index
    %0 = vector.load %arg1[%c0, %c0_0] : memref<8x32xbf16, #tpu.memory_space<vmem>>, vector<8x32xbf16>
    %c0_1 = arith.constant 0 : index
    %c0_2 = arith.constant 0 : index
    %1 = vector.load %arg2[%c0_1, %c0_2] : memref<32x64xbf16, #tpu.memory_space<vmem>>, vector<32x64xbf16>
    %cst = arith.constant dense<0.000000e+00> : vector<8x64xf32>
    %2 = tpu.matmul %0, %1, %cst {dimension_numbers = #tpu.dot_dimension_numbers<[1], [0], [0], [1], [0, 0, 1, 1], [], []>} : vector<8x32xbf16>, vector<32x64xbf16>, vector<8x64xf32> -> vector<8x64xf32>
    %c0_3 = arith.constant 0 : index
    %c0_4 = arith.constant 0 : index
    %3 = vector.load %arg3[%c0_3, %c0_4] : memref<1x64xf32, #tpu.memory_space<vmem>>, vector<1x64xf32>
    %4 = vector.broadcast %3 : vector<1x64xf32> to vector<8x64xf32>
    %5 = arith.addf %2, %4 : vector<8x64xf32>
    %cst_5 = arith.constant 0.000000e+00 : f32
    %6 = vector.broadcast %cst_5 : f32 to vector<8x64xf32>
    %7 = arith.maximumf %5, %6 : vector<8x64xf32>
    %8 = arith.truncf %7 : vector<8x64xf32> to vector<8x64xbf16>
    %c0_6 = arith.constant 0 : index
    %c0_7 = arith.constant 0 : index
    %9 = vector.load %arg4[%c0_6, %c0_7] : memref<64x64xbf16, #tpu.memory_space<vmem>>, vector<64x64xbf16>
    %cst_8 = arith.constant dense<0.000000e+00> : vector<8x64xf32>
    %10 = tpu.matmul %8, %9, %cst_8 {dimension_numbers = #tpu.dot_dimension_numbers<[1], [0], [0], [1], [0, 0, 1, 1], [], []>} : vector<8x64xbf16>, vector<64x64xbf16>, vector<8x64xf32> -> vector<8x64xf32>
    %c0_9 = arith.constant 0 : index
    %c0_10 = arith.constant 0 : index
    %11 = vector.load %arg5[%c0_9, %c0_10] : memref<1x64xf32, #tpu.memory_space<vmem>>, vector<1x64xf32>
    %12 = vector.broadcast %11 : vector<1x64xf32> to vector<8x64xf32>
    %13 = arith.addf %10, %12 : vector<8x64xf32>
    %cst_11 = arith.constant 0.000000e+00 : f32
    %14 = vector.broadcast %cst_11 : f32 to vector<8x64xf32>
    %15 = arith.maximumf %13, %14 : vector<8x64xf32>
    %16 = arith.truncf %15 : vector<8x64xf32> to vector<8x64xbf16>
    %c0_12 = arith.constant 0 : index
    %c0_13 = arith.constant 0 : index
    %17 = vector.load %arg6[%c0_12, %c0_13] : memref<64x128xbf16, #tpu.memory_space<vmem>>, vector<64x128xbf16>
    %cst_14 = arith.constant dense<0.000000e+00> : vector<8x128xf32>
    %18 = tpu.matmul %16, %17, %cst_14 {dimension_numbers = #tpu.dot_dimension_numbers<[1], [0], [0], [1], [0, 0, 1, 1], [], []>} : vector<8x64xbf16>, vector<64x128xbf16>, vector<8x128xf32> -> vector<8x128xf32>
    %c0_15 = arith.constant 0 : index
    %c0_16 = arith.constant 0 : index
    %19 = vector.load %arg7[%c0_15, %c0_16] : memref<1x128xf32, #tpu.memory_space<vmem>>, vector<1x128xf32>
    %20 = vector.broadcast %19 : vector<1x128xf32> to vector<8x128xf32>
    %21 = arith.addf %18, %20 : vector<8x128xf32>
    %c0_17 = arith.constant 0 : index
    %c0_18 = arith.constant 0 : index
    %22 = vector.load %arg8[%c0_17, %c0_18] : memref<8x128xf32, #tpu.memory_space<vmem>>, vector<8x128xf32>
    tpu.vector_store %arg8[%c0_17, %c0_18], %21 {strides = array<i32>} : memref<8x128xf32, #tpu.memory_space<vmem>>, vector<8x128xf32>,
    return
  }
  func.func @transform_0(%arg0: i32) -> (i32, i32) {
    %c0_i32 = arith.constant 0 : i32
    %c0_i32_0 = arith.constant 0 : i32
    return %arg0, %c0_i32 : i32, i32
  }
  func.func @transform_1(%arg0: i32) -> (i32, i32) {
    %c0_i32 = arith.constant 0 : i32
    %c0_i32_0 = arith.constant 0 : i32
    %c0_i32_1 = arith.constant 0 : i32
    return %c0_i32, %c0_i32_0 : i32, i32
  }
  func.func @transform_2(%arg0: i32) -> (i32, i32) {
    %c0_i32 = arith.constant 0 : i32
    %c0_i32_0 = arith.constant 0 : i32
    %c0_i32_1 = arith.constant 0 : i32
    return %c0_i32, %c0_i32_0 : i32, i32
  }
  func.func @transform_3(%arg0: i32) -> (i32, i32) {
    %c0_i32 = arith.constant 0 : i32
    %c0_i32_0 = arith.constant 0 : i32
    %c0_i32_1 = arith.constant 0 : i32
    return %c0_i32, %c0_i32_0 : i32, i32
  }
  func.func @transform_4(%arg0: i32) -> (i32, i32) {
    %c0_i32 = arith.constant 0 : i32
    %c0_i32_0 = arith.constant 0 : i32
    %c0_i32_1 = arith.constant 0 : i32
    return %c0_i32, %c0_i32_0 : i32, i32
  }
  func.func @transform_5(%arg0: i32) -> (i32, i32) {
    %c0_i32 = arith.constant 0 : i32
    %c0_i32_0 = arith.constant 0 : i32
    %c0_i32_1 = arith.constant 0 : i32
    return %c0_i32, %c0_i32_0 : i32, i32
  }
  func.func @transform_6(%arg0: i32) -> (i32, i32) {
    %c0_i32 = arith.constant 0 : i32
    %c0_i32_0 = arith.constant 0 : i32
    %c0_i32_1 = arith.constant 0 : i32
    return %c0_i32, %c0_i32_0 : i32, i32
  }
  func.func @transform_7(%arg0: i32) -> (i32, i32) {
    %c0_i32 = arith.constant 0 : i32
    %c0_i32_0 = arith.constant 0 : i32
    return %arg0, %c0_i32 : i32, i32
  }
}

</mosaic_0001>

<bundles_post_ra>
// kernel: tpu_custom_call.1
= control target key start
LH: loop header
LB: loop body
LE: loop exit
PB: predicated region body
PF: predicated region fallthrough
CT: control target
= control target key end

     0   :  { %12 = vsyncpa [#allocation3], 0  ;;  %s666_s0 = inlined_call_operand.hbm [shape: bf16[8,32], index: 0, kind: input, shape index: {}]   ;;  %s667_s1 = inlined_call_operand.hbm [shape: bf16[32,64], index: 1, kind: input, shape index: {}]   ;;  %s668_s2 = inlined_call_operand.vmem [shape: f32[1,64], index: 2, kind: input, shape index: {}]   ;;  %s669_s3 = inlined_call_operand.hbm [shape: bf16[64,64], index: 3, kind: input, shape index: {}]   ;;  %s670_s4 = inlined_call_operand.vmem [shape: f32[1,64], index: 4, kind: input, shape index: {}]   ;;  %s671_s5 = inlined_call_operand.hbm [shape: bf16[64,128], index: 5, kind: input, shape index: {}]   ;;  %s672_s6 = inlined_call_operand.vmem [shape: f32[1,128], index: 6, kind: input, shape index: {}]   ;;  %s673_s7 = inlined_call_operand.hbm [shape: f32[8,128], index: 7, kind: output, shape index: {}]  }
   0x1   :  { %13 = vsyncpa [#allocation6], 0 }
   0x2   :  { %14 = vsyncpa [#allocation9], 0 }
   0x3   :  { %15 = vsyncpa [#allocation4], 0  ;;  %s534_s24 = smov [#allocation5]   ;;  %s416_s28 = scalar_lea.hbm %s667_s1, 256 }
   0x4   :  { %s31_s25 = sshll.u32 %s534_s24, 4  ;;  %p417_p0 = scmp.ne.s32.totalorder %s667_s1, %s416_s28  ;;  %s32_s25 = int_to_ptr.vmem [resolvable:$true] %s31_s25 }
   0x5   :  { %p420_p1 = scmp.lt.u32.totalorder %s416_s28, %s667_s1 }
   0x7   :  { %p422_p2 = pnand %p420_p1, %p417_p0 }
   0x9   :  { %425 = shalt.err (!%p422_p2)
}
   0xa   :  { %s426_s10 = scalar_lea.vmem %s32_s25, 256  ;;  %p431_p4 = scmp.lt.s32.totalorder %s32_s25, %s32_s25 }
   0xb   :  { %p427_p3 = scmp.ne.s32.totalorder %s32_s25, %s426_s10  ;;  %p432_p5 = scmp.lt.s32.totalorder %s426_s10, %s426_s10 }
   0xd   :  { %p433_p6 = por %p432_p5, %p431_p4 }
   0xf   :  { %p434_p7 = pnand %p433_p6, %p427_p3 }
  0x11   :  { %437 = shalt.err (!%p434_p7)
}
  0x12   :  { %s535_s11 = smov 64   ;;  %s536_s12 = smov 4  }
  0x13   :  { %37 = dma.hbm_to_vmem [thread:$0]  %s667_s1, 256, %s32_s25, [#allocation6], %s535_s11, %s535_s11, %s536_s12  }
  0x14   :  { %s537_s15 = smov [#allocation2]   ;;  %s538_s17 = smov [#allocation7]  }
  0x15   :  { %s22_s16 = sshll.u32 %s537_s15, 4  ;;  %s45_s18 = sshll.u32 %s538_s17, 4  ;;  %s23_s16 = int_to_ptr.vmem [resolvable:$true] %s22_s16  ;;  %s46_s18 = int_to_ptr.vmem [resolvable:$true] %s45_s18 }
  0x16   :  { %s438_s21 = scalar_lea.hbm %s666_s0, 64 }
  0x17   :  { %p439_p8 = scmp.ne.s32.totalorder %s666_s0, %s438_s21  ;;  %p442_p9 = scmp.lt.u32.totalorder %s438_s21, %s666_s0 }
  0x19   :  { %p444_p10 = pnand %p442_p9, %p439_p8 }
  0x1b   :  { %447 = shalt.err (!%p444_p10)
}
  0x1c   :  { %s448_s1 = scalar_lea.vmem %s23_s16, 64  ;;  %p453_p12 = scmp.lt.s32.totalorder %s23_s16, %s23_s16 }
  0x1d   :  { %p449_p11 = scmp.ne.s32.totalorder %s23_s16, %s448_s1  ;;  %p454_p13 = scmp.lt.s32.totalorder %s448_s1, %s448_s1 }
  0x1f   :  { %p455_p0 = por %p454_p13, %p453_p12 }
  0x21   :  { %p456_p1 = pnand %p455_p0, %p449_p11 }
  0x23   :  { %459 = shalt.err (!%p456_p1)
}
  0x24   :  { %25 = dma.hbm_to_vmem [thread:$0]  %s666_s0, 64, %s23_s16, [#allocation3]  }
  0x25   :  { %s460_s30 = scalar_lea.hbm %s669_s3, 512 }
  0x26   :  { %p461_p2 = scmp.ne.s32.totalorder %s669_s3, %s460_s30  ;;  %p464_p3 = scmp.lt.u32.totalorder %s460_s30, %s669_s3 }
  0x28   :  { %p466_p4 = pnand %p464_p3, %p461_p2 }
  0x2a   :  { %469 = shalt.err (!%p466_p4)
}
  0x2b   :  { %s470_s14 = scalar_lea.vmem %s46_s18, 512  ;;  %p475_p6 = scmp.lt.s32.totalorder %s46_s18, %s46_s18 }
  0x2c   :  { %p471_p5 = scmp.ne.s32.totalorder %s46_s18, %s470_s14  ;;  %p476_p7 = scmp.lt.s32.totalorder %s470_s14, %s470_s14 }
  0x2e   :  { %p477_p8 = por %p476_p7, %p475_p6 }
  0x30   :  { %p478_p9 = pnand %p477_p8, %p471_p5 }
  0x32   :  { %481 = shalt.err (!%p478_p9)
}
  0x33   :  { %51 = dma.hbm_to_vmem [thread:$0]  %s669_s3, 512, %s46_s18, [#allocation6], %s535_s11, %s535_s11, %s536_s12  }
  0x34   :  { %s539_s16 = smov [#allocation8]   ;;  %s482_s21 = scalar_lea.hbm %s671_s5, 512 }
  0x35   :  { %s59_s17 = sshll.u32 %s539_s16, 4  ;;  %p483_p10 = scmp.ne.s32.totalorder %s671_s5, %s482_s21  ;;  %s60_s17 = int_to_ptr.vmem [resolvable:$true] %s59_s17 }
  0x36   :  { %p486_p11 = scmp.lt.u32.totalorder %s482_s21, %s671_s5 }
  0x38   :  { %p488_p12 = pnand %p486_p11, %p483_p10 }
  0x3a   :  { %491 = shalt.err (!%p488_p12)
}
  0x3b   :  { %s492_s1 = scalar_lea.vmem %s60_s17, 512  ;;  %p497_p0 = scmp.lt.s32.totalorder %s60_s17, %s60_s17 }
  0x3c   :  { %p493_p13 = scmp.ne.s32.totalorder %s60_s17, %s492_s1  ;;  %p498_p1 = scmp.lt.s32.totalorder %s492_s1, %s492_s1 }
  0x3e   :  { %p499_p2 = por %p498_p1, %p497_p0 }
  0x40   :  { %p500_p3 = pnand %p499_p2, %p493_p13 }
  0x42   :  { %503 = shalt.err (!%p500_p3)
}
  0x43   :  { %65 = dma.hbm_to_vmem [thread:$0]  %s671_s5, 512, %s60_s17, [#allocation9], %s535_s11, %s535_s11, %s536_s12  }
  0x44   :  { %526 = dma.done.wait [#allocation3], 64  }
  0x45   :  { %527 = vsyncadd [#allocation3], 4294967232 }
  0x46   :  { %528 = dma.done.wait [#allocation6], 768  }
  0x47   :  { %529 = vsyncadd [#allocation6], 4294966528 }
  0x48   :  { %530 = dma.done.wait [#allocation9], 512  }
  0x49   :  { %531 = vsyncadd [#allocation9], 4294966784  ;;  %v540_v0 = vmov 0.0   ;;  %vm541_vm0 = vmmov 0   ;;  %v406_v1 = vld [vmem:[#allocation5] sm:$0xff]   ;;  %v407_v2 = vld [vmem:[#allocation5 + $0x8] sm:$0xff]  }
  0x4a   :  { %365 = vmatprep.subr.bf16.mxu0 %v540_v0  ;;  %369 = vmatprep.mubr.msk.bf16.mxu0 %vm541_vm0, %v540_v0  ;;  %v408_v3 = vld [vmem:[#allocation7] sm:$0xff]   ;;  %v81_v4 = vld [vmem:[#allocation2] sm:$0xf]  ;;  %vm105_vm1 = vcmask 261120   ;;  %v410_v6 = vld [vmem:[#allocation7 + $0x10] sm:$0xff]   ;;  %vm190_vm2 = vcmask 523264  }
  0x4b   :  { %373 = vmatprep.subr.bf16.mxu1 %v540_v0  ;;  %381 = vmatprep.mubr.msk.bf16.mxu1 %vm541_vm0, %v540_v0  ;;  %v409_v5 = vld [vmem:[#allocation7 + $0x8] sm:$0xff]   ;;  %v411_v7 = vld [vmem:[#allocation7 + $0x18] sm:$0xff]   ;;  %v412_v8 = vld [vmem:[#allocation8] sm:$0xff]   ;;  %s542_s28 = smov [#allocation10]  }
  0x4c   :  { %366 = vmatpush3.bf16.msra.mxu0 %v406_v1  ;;  %374 = vmatpush3.bf16.msra.mxu1 %v408_v3  ;;  %v413_v9 = vld [vmem:[#allocation8 + $0x8] sm:$0xff]   ;;  %v414_v18 = vld [vmem:[#allocation8 + $0x10] sm:$0xff]   ;;  %v415_v19 = vld [vmem:[#allocation8 + $0x18] sm:$0xff]   ;;  %s325_s29 = sshll.u32 %s542_s28, 4  ;;  %s326_s29 = int_to_ptr.vmem [resolvable:$true] %s325_s29 }
  0x4d   :  { %367 = vmatprep.subr.bf16.mxu0 %v540_v0  ;;  %375 = vmatprep.subr.bf16.mxu1 %v540_v0  ;;  %v336_v10 = vld [vmem:[%s668_s2] ss:$0 sm:$0xff]  ;;  %p509_p5 = scmp.lt.s32.totalorder %s326_s29, %s326_s29 }
  0x4e   :  { %v340_v20 = vld [vmem:[%s670_s4] ss:$0 sm:$0xff]  ;;  %s504_s4 = scalar_lea.vmem %s326_s29, 128 }
  0x4f   :  { %v346_v28 = vld [vmem:[%s672_s6] ss:$0 sm:$0xff]  ;;  %p505_p4 = scmp.ne.s32.totalorder %s326_s29, %s504_s4  ;;  %p510_p6 = scmp.lt.s32.totalorder %s504_s4, %s504_s4 }
  0x50   :  { %368 = vmatpush3.bf16.msra.mxu0 %v407_v2  ;;  %376 = vmatpush3.bf16.msra.mxu1 %v409_v5 }
  0x51   :  { %385 = vmatprep.subr.bf16.mxu0 %v540_v0  ;;  %377 = vmatprep.subr.bf16.mxu1 %v540_v0  ;;  %p511_p7 = por %p510_p6, %p509_p5 }
  0x53   :  { %370 = vmatmul.mubr.msk.bf16.vlgmr.msra.gmra.mrb[0].mxu0 %vm105_vm1, %v81_v4  ;;  %p512_p8 = pnand %p511_p7, %p505_p4 }
  0x54   :  { %393 = vmatprep.mubr.msk.bf16.mxu0 %vm541_vm0, %v540_v0  ;;  %378 = vmatpush3.bf16.msra.mxu1 %v410_v6 }
  0x55   :  { %379 = vmatprep.subr.bf16.mxu1 %v540_v0  ;;  %386 = vmatpush3.bf16.msra.mxu0 %v412_v8 }
  0x56   :  { %387 = vmatprep.subr.bf16.mxu0 %v540_v0 }
  0x58   :  { %380 = vmatpush3.bf16.msra.mxu1 %v411_v7 }
  0x59   :  { %388 = vmatpush3.bf16.msra.mxu0 %v413_v9 }
  0x5a   :  { %389 = vmatprep.subr.bf16.mxu0 %v540_v0 }
  0x5d   :  { %390 = vmatpush3.bf16.msra.mxu0 %v414_v18 }
  0x5e   :  { %391 = vmatprep.subr.bf16.mxu0 %v540_v0 }
  0x61   :  { %392 = vmatpush3.bf16.msra.mxu0 %v415_v19 }
 0x126   :  { %v143_v11 = vpop.f32.mrb[0].mxu0 }
 0x127   :  { %v144_v12 = vadd.f32 %v336_v10, %v143_v11  ;;  %v371_v13 = vpop.f32.mrb[1].mxu0 }
 0x128   :  { %v146_v14 = vpop.f32.mrb[2].mxu0 }
 0x129   :  { %v149_v15 = vmax.f32 %v144_v12, 0.0  ;;  %v372_v16 = vpop.f32.mrb[3].mxu0 }
 0x12b   :  { %v150_v17 = vpack.c.bf16 %v149_v15, %v149_v15 }
 0x12d   :  { %382 = vmatmul.mubr.msk.bf16.vlgmr.msra.gmra.mrb[0].mxu1 %vm190_vm2, %v150_v17 }
 0x200   :  { %v228_v21 = vpop.f32.mrb[0].mxu1 }
 0x201   :  { %v229_v22 = vadd.f32 %v340_v20, %v228_v21  ;;  %v383_v23 = vpop.f32.mrb[1].mxu1 }
 0x202   :  { %v231_v24 = vpop.f32.mrb[2].mxu1 }
 0x203   :  { %v234_v25 = vmax.f32 %v229_v22, 0.0  ;;  %v384_v26 = vpop.f32.mrb[3].mxu1 }
 0x205   :  { %v235_v27 = vpack.c.bf16 %v234_v25, %v234_v25 }
 0x207   :  { %394 = vmatmul.mubr.msk.bf16.vlgmr.msra.gmra.mrb[4].mxu0 %vm190_vm2, %v235_v27 }
 0x2da   :  { %v312_v29 = vpop.f32.mrb[4].mxu0 }
 0x2db   :  { %v313_v30 = vadd.f32 %v346_v28, %v312_v29  ;;  %v395_v31 = vpop.f32.mrb[5].mxu0 }
 0x2dc   :  { %v315_v32 = vpop.f32.mrb[6].mxu0 }
 0x2dd   :  { %318 = vst [vmem:[#allocation10] sm:$0xff] %v313_v30  ;;  %v396_v33 = vpop.f32.mrb[7].mxu0 }
 0x2de   :  { %515 = shalt.err (!%p512_p8)
}
 0x2df   :  { %s516_s6 = scalar_lea.hbm %s673_s7, 128 }
 0x2e0   :  { %p517_p9 = scmp.ne.s32.totalorder %s673_s7, %s516_s6  ;;  %p520_p10 = scmp.lt.u32.totalorder %s516_s6, %s673_s7 }
 0x2e2   :  { %p522_p11 = pnand %p520_p10, %p517_p9 }
 0x2e4   :  { %525 = shalt.err (!%p522_p11)
}
 0x2e5   :  { %328 = dma.vmem_to_hbm [thread:$0]  %s326_s29, 128, %s673_s7, [#allocation4]  }
 0x2e6   :  { %532 = dma.done.wait [#allocation4], 128  }
 0x2e7   :  { %533 = vsyncadd [#allocation4], 4294967168 }
 0x2e8   :  { %332 = vsyncpa [#allocation3], 1 }
 0x2e9   :  { %333 = vsyncpa [#allocation6], 1 }
 0x2ea   :  { %334 = vsyncpa [#allocation9], 1 }
 0x2eb   :  { %335 = vsyncpa [#allocation4], 1 }

</bundles_post_ra>
